<compile_context>
chip_gen: v5e
topology: v5e:2x2
jax: 0.10.0
libtpu: 0.0.40
codegen_flags: <defaults>
</compile_context>

<pallas_src>
import jax
import jax.numpy as jnp
from jax import lax
from jax.experimental import pallas as pl
from jax.experimental.pallas import tpu as pltpu

HIDDEN = 32          # hidden width per head
N_HEADS = 3          # sell / buy / do-nothing
H3 = HIDDEN * N_HEADS

# NT matmul (a @ b.T): contract the last dim of both operands.  MXU-native;
# same dimension_numbers pattern the reference flash-attention kernel uses.
_NT = (((1,), (1,)), ((), ()))


def _ffn_q_kernel(state_ref, vs_ref, vb_ref,
                  w1t_ref, w1vs_ref, w1vb_ref, b1_ref, w2t_ref, b2_ref,
                  o_ref):
    # Layer 1, batch-on-lanes: (96, d) @ (tb, d)^T -> (96, tb) on the MXU.
    ht = lax.dot_general(w1t_ref[...], state_ref[...], _NT,
                         preferred_element_type=jnp.float32)
    # Volume columns of W1 as rank-1 terms: (96,1)*(1,tb) broadcast mults (VPU).
    ht = ht + w1vs_ref[...] * vs_ref[...]
    ht = ht + w1vb_ref[...] * vb_ref[...]
    h = jnp.tanh(ht + b1_ref[...])                              # EUP
    # Layer 2: (3, 96) @ (96, tb) -> (3, tb); lane-dense unmasked store.
    o_ref[...] = (jnp.dot(w2t_ref[...], h, preferred_element_type=jnp.float32)
                  + b2_ref[...]).astype(o_ref.dtype)


def ffn_q_forward_t(state, volume_sell, volume_buy, packed, *, tile_b=4096):
    """Lane-dense forward: returns (3, batch) = rows [q_sell, q_buy, q_none]."""
    batch, sd = state.shape
    # (batch,) or (batch,1) -> (1, batch): pure reshape (contiguous), lane-dense.
    vs = volume_sell.reshape(1, batch)
    vb = volume_buy.reshape(1, batch)

    if batch <= tile_b:
        tb = batch                                  # full extent: no (8,128) rule
    else:
        tb = max(128, (tile_b // 128) * 128)        # lane/sublane aligned tile
    grid = (pl.cdiv(batch, tb),)

    flops = 2 * batch * sd * H3 + 4 * batch * H3 + 2 * batch * H3 * N_HEADS
    bytes_accessed = 4 * (batch * sd + 2 * batch            # state + volumes
                          + H3 * sd + 3 * H3                # W1^T, vol cols, b1
                          + N_HEADS * H3 + N_HEADS          # W2^T, b2
                          + N_HEADS * batch)                # output

    return pl.pallas_call(
        _ffn_q_kernel,
        out_shape=jax.ShapeDtypeStruct((N_HEADS, batch), jnp.float32),
        grid_spec=pltpu.PrefetchScalarGridSpec(
            num_scalar_prefetch=0,
            grid=grid,
            in_specs=[
                pl.BlockSpec((tb, sd), lambda i: (i, 0)),        # state tile
                pl.BlockSpec((1, tb), lambda i: (0, i)),         # vol_sell (lanes)
                pl.BlockSpec((1, tb), lambda i: (0, i)),         # vol_buy  (lanes)
                pl.BlockSpec((H3, sd), lambda i: (0, 0)),        # W1_state^T (resident)
                pl.BlockSpec((H3, 1), lambda i: (0, 0)),         # W1 sell-volume col
                pl.BlockSpec((H3, 1), lambda i: (0, 0)),         # W1 buy-volume col
                pl.BlockSpec((H3, 1), lambda i: (0, 0)),         # b1
                pl.BlockSpec((N_HEADS, H3), lambda i: (0, 0)),   # W2^T (block struct.)
                pl.BlockSpec((N_HEADS, 1), lambda i: (0, 0)),    # b2
            ],
            out_specs=pl.BlockSpec((N_HEADS, tb), lambda i: (0, i)),
        ),
        compiler_params=pltpu.CompilerParams(
            dimension_semantics=("parallel",),   # shard batch axis across TCs (v7x)
        ),
        cost_estimate=pl.CostEstimate(
            flops=flops,
            transcendentals=batch * H3,
            bytes_accessed=bytes_accessed,
        ),
    )(state, vs, vb, packed["w1t"], packed["w1_vs"], packed["w1_vb"],
      packed["b1t"], packed["w2t"], packed["b2t"])


def ffn_q_forward(state, volume_sell, volume_buy, packed, *, tile_b=4096):
    """Module-contract forward: (batch, 3) = [q_sell, q_buy, q_none].

    The (3, batch) -> (batch, 3) transpose is a tiny wrapper op; TPU-native
    consumers should call ffn_q_forward_t directly and keep the lane-dense layout.
    """
    out_t = ffn_q_forward_t(state, volume_sell, volume_buy, packed, tile_b=tile_b)
    return out_t.T


# ----------------------------------------------------------------------------
# Parameter init (per-head, PyTorch-Linear-like) + one-time packing.
# ----------------------------------------------------------------------------

def _init_linear(key, fan_in, fan_out):
    kw, kb = jax.random.split(key)
    bound = 1.0 / jnp.sqrt(float(fan_in))
    w = jax.random.uniform(kw, (fan_in, fan_out), jnp.float32, -bound, bound)
    b = jax.random.uniform(kb, (1, fan_out), jnp.float32, -bound, bound)
    return w, b


def init_ffn_q_params(key, state_dim):
    params = {}
    keys = jax.random.split(key, 6)
    for name, in_dim, (k1, k2) in (
        ("sell", state_dim + 1, (keys[0], keys[1])),
        ("buy", state_dim + 1, (keys[2], keys[3])),
        ("none", state_dim, (keys[4], keys[5])),
    ):
        w1, b1 = _init_linear(k1, in_dim, HIDDEN)
        w2, b2 = _init_linear(k2, HIDDEN, 1)
        params[name] = {"w1": w1, "b1": b1, "w2": w2, "b2": b2}
    return params


def pack_ffn_q_params(params, state_dim):
    """Pack the three heads into fused, transposed weights. Call ONCE at init."""
    sd = state_dim

    # W1_state^T: (96, sd). Rows 0:32 sell, 32:64 buy, 64:96 do-nothing.
    w1t = jnp.zeros((H3, sd), jnp.float32)
    w1t = w1t.at[0 * HIDDEN:1 * HIDDEN, :].set(params["sell"]["w1"][:sd].T)
    w1t = w1t.at[1 * HIDDEN:2 * HIDDEN, :].set(params["buy"]["w1"][:sd].T)
    w1t = w1t.at[2 * HIDDEN:3 * HIDDEN, :].set(params["none"]["w1"].T)

    # Volume rows of W1 as (96,1) columns, zero outside their own head's block.
    w1_vs = jnp.zeros((H3, 1), jnp.float32)
    w1_vs = w1_vs.at[0 * HIDDEN:1 * HIDDEN, 0].set(params["sell"]["w1"][sd])
    w1_vb = jnp.zeros((H3, 1), jnp.float32)
    w1_vb = w1_vb.at[1 * HIDDEN:2 * HIDDEN, 0].set(params["buy"]["w1"][sd])

    b1t = jnp.concatenate(
        [params["sell"]["b1"], params["buy"]["b1"], params["none"]["b1"]], axis=-1
    ).reshape(H3, 1)

    # W2^T: (3, 96) block-structured so each output row only sees its own head.
    w2t = jnp.zeros((N_HEADS, H3), jnp.float32)
    w2t = w2t.at[0, 0 * HIDDEN:1 * HIDDEN].set(params["sell"]["w2"][:, 0])
    w2t = w2t.at[1, 1 * HIDDEN:2 * HIDDEN].set(params["buy"]["w2"][:, 0])
    w2t = w2t.at[2, 2 * HIDDEN:3 * HIDDEN].set(params["none"]["w2"][:, 0])

    b2t = jnp.stack(
        [params["sell"]["b2"][0, 0], params["buy"]["b2"][0, 0],
         params["none"]["b2"][0, 0]]
    ).reshape(N_HEADS, 1)

    return {"w1t": w1t, "w1_vs": w1_vs, "w1_vb": w1_vb,
            "b1t": b1t, "w2t": w2t, "b2t": b2t}


def _reference(state, volume_sell, volume_buy, params):
    """Pure-JAX reference on the UNPACKED per-head params."""
    def head(x, p):
        h = jnp.tanh(x @ p["w1"] + p["b1"])
        return h @ p["w2"] + p["b2"]

    xs = jnp.concatenate([state, volume_sell[:, None]], axis=-1)
    xb = jnp.concatenate([state, volume_buy[:, None]], axis=-1)
    return jnp.concatenate(
        [head(xs, params["sell"]), head(xb, params["buy"]), head(state, params["none"])],
        axis=-1,
    )


if __name__ == "__main__":
    key = jax.random.PRNGKey(0)
    k_state, k_vs, k_vb, k_params, k_big = jax.random.split(key, 5)

    # --- small, module-consistent shapes ---
    batch, state_dim = 8, 7
    state = jax.random.normal(k_state, (batch, state_dim), jnp.float32)
    volume_sell = jax.random.normal(k_vs, (batch,), jnp.float32)
    volume_buy = jax.random.normal(k_vb, (batch,), jnp.float32)

    params = init_ffn_q_params(k_params, state_dim)
    packed = pack_ffn_q_params(params, state_dim)   # one-time weight packing

    out = ffn_q_forward(state, volume_sell, volume_buy, packed)
    out = jax.block_until_ready(out)
    ref = _reference(state, volume_sell, volume_buy, params)
    assert out.shape == (batch, 3)
    assert jnp.allclose(out, ref, atol=1e-5, rtol=1e-5)

    # --- exercise the tiled / multi-step grid path (incl. a partial last tile) ---
    big = 640
    kb1, kb2, kb3 = jax.random.split(k_big, 3)
    state_b = jax.random.normal(kb1, (big, state_dim), jnp.float32)
    vs_b = jax.random.normal(kb2, (big,), jnp.float32)
    vb_b = jax.random.normal(kb3, (big,), jnp.float32)
    out_b = jax.block_until_ready(
        ffn_q_forward(state_b, vs_b, vb_b, packed, tile_b=256)
    )
    ref_b = _reference(state_b, vs_b, vb_b, params)
    assert out_b.shape == (big, 3)
    assert jnp.allclose(out_b, ref_b, atol=1e-5, rtol=1e-5)

    print("KERNEL_OK")
</pallas_src>

<mosaic_0001>
module attributes {stable_mosaic.version = 11 : i64} {
  func.func @_ffn_q_kernel(%arg0: i32, %arg1: memref<8x7xf32, #tpu.memory_space<vmem>>, %arg2: memref<1x8xf32, #tpu.memory_space<vmem>>, %arg3: memref<1x8xf32, #tpu.memory_space<vmem>>, %arg4: memref<96x7xf32, #tpu.memory_space<vmem>>, %arg5: memref<96x1xf32, #tpu.memory_space<vmem>>, %arg6: memref<96x1xf32, #tpu.memory_space<vmem>>, %arg7: memref<96x1xf32, #tpu.memory_space<vmem>>, %arg8: memref<3x96xf32, #tpu.memory_space<vmem>>, %arg9: memref<3x1xf32, #tpu.memory_space<vmem>>, %arg10: memref<3x8xf32, #tpu.memory_space<vmem>>) attributes {dimension_semantics = [#tpu.dimension_semantics<parallel>], iteration_bounds = array<i64: 1>, scalar_prefetch = 0 : i64, scratch_operands = 0 : i64, tpu.core_type = #tpu.core_type<tc>, window_params = [{transform_indices = @transform_0, window_bounds = array<i64: 8, 7>}, {transform_indices = @transform_1, window_bounds = array<i64: 1, 8>}, {transform_indices = @transform_2, window_bounds = array<i64: 1, 8>}, {pipeline_mode = #tpu.pipeline_mode<synchronous>, transform_indices = @transform_3, window_bounds = array<i64: 96, 7>}, {pipeline_mode = #tpu.pipeline_mode<synchronous>, transform_indices = @transform_4, window_bounds = array<i64: 96, 1>}, {pipeline_mode = #tpu.pipeline_mode<synchronous>, transform_indices = @transform_5, window_bounds = array<i64: 96, 1>}, {pipeline_mode = #tpu.pipeline_mode<synchronous>, transform_indices = @transform_6, window_bounds = array<i64: 96, 1>}, {pipeline_mode = #tpu.pipeline_mode<synchronous>, transform_indices = @transform_7, window_bounds = array<i64: 3, 96>}, {pipeline_mode = #tpu.pipeline_mode<synchronous>, transform_indices = @transform_8, window_bounds = array<i64: 3, 1>}, {transform_indices = @transform_9, window_bounds = array<i64: 3, 8>}]} {
    %c0 = arith.constant 0 : index
    %c0_0 = arith.constant 0 : index
    %0 = vector.load %arg4[%c0, %c0_0] : memref<96x7xf32, #tpu.memory_space<vmem>>, vector<96x7xf32>
    %c0_1 = arith.constant 0 : index
    %c0_2 = arith.constant 0 : index
    %1 = vector.load %arg1[%c0_1, %c0_2] : memref<8x7xf32, #tpu.memory_space<vmem>>, vector<8x7xf32>
    %cst = arith.constant dense<0.000000e+00> : vector<96x8xf32>
    %2 = tpu.matmul %0, %1, %cst {dimension_numbers = #tpu.dot_dimension_numbers<[1], [1], [0], [0], [0, 0, 1, 0], [], []>} : vector<96x7xf32>, vector<8x7xf32>, vector<96x8xf32> -> vector<96x8xf32>
    %c0_3 = arith.constant 0 : index
    %c0_4 = arith.constant 0 : index
    %3 = vector.load %arg5[%c0_3, %c0_4] : memref<96x1xf32, #tpu.memory_space<vmem>>, vector<96x1xf32>
    %c0_5 = arith.constant 0 : index
    %c0_6 = arith.constant 0 : index
    %4 = vector.load %arg2[%c0_5, %c0_6] : memref<1x8xf32, #tpu.memory_space<vmem>>, vector<1x8xf32>
    %5 = vector.broadcast %3 : vector<96x1xf32> to vector<96x8xf32>
    %6 = vector.broadcast %4 : vector<1x8xf32> to vector<96x8xf32>
    %7 = arith.mulf %5, %6 : vector<96x8xf32>
    %8 = arith.addf %2, %7 : vector<96x8xf32>
    %c0_7 = arith.constant 0 : index
    %c0_8 = arith.constant 0 : index
    %9 = vector.load %arg6[%c0_7, %c0_8] : memref<96x1xf32, #tpu.memory_space<vmem>>, vector<96x1xf32>
    %c0_9 = arith.constant 0 : index
    %c0_10 = arith.constant 0 : index
    %10 = vector.load %arg3[%c0_9, %c0_10] : memref<1x8xf32, #tpu.memory_space<vmem>>, vector<1x8xf32>
    %11 = vector.broadcast %9 : vector<96x1xf32> to vector<96x8xf32>
    %12 = vector.broadcast %10 : vector<1x8xf32> to vector<96x8xf32>
    %13 = arith.mulf %11, %12 : vector<96x8xf32>
    %14 = arith.addf %8, %13 : vector<96x8xf32>
    %c0_11 = arith.constant 0 : index
    %c0_12 = arith.constant 0 : index
    %15 = vector.load %arg7[%c0_11, %c0_12] : memref<96x1xf32, #tpu.memory_space<vmem>>, vector<96x1xf32>
    %16 = vector.broadcast %15 : vector<96x1xf32> to vector<96x8xf32>
    %17 = arith.addf %14, %16 : vector<96x8xf32>
    %18 = math.tanh %17 : vector<96x8xf32>
    %c0_13 = arith.constant 0 : index
    %c0_14 = arith.constant 0 : index
    %19 = vector.load %arg8[%c0_13, %c0_14] : memref<3x96xf32, #tpu.memory_space<vmem>>, vector<3x96xf32>
    %cst_15 = arith.constant dense<0.000000e+00> : vector<3x8xf32>
    %20 = tpu.matmul %19, %18, %cst_15 {dimension_numbers = #tpu.dot_dimension_numbers<[1], [0], [0], [1], [0, 0, 1, 1], [], []>} : vector<3x96xf32>, vector<96x8xf32>, vector<3x8xf32> -> vector<3x8xf32>
    %c0_16 = arith.constant 0 : index
    %c0_17 = arith.constant 0 : index
    %21 = vector.load %arg9[%c0_16, %c0_17] : memref<3x1xf32, #tpu.memory_space<vmem>>, vector<3x1xf32>
    %22 = vector.broadcast %21 : vector<3x1xf32> to vector<3x8xf32>
    %23 = arith.addf %20, %22 : vector<3x8xf32>
    %c0_18 = arith.constant 0 : index
    %c0_19 = arith.constant 0 : index
    %24 = vector.load %arg10[%c0_18, %c0_19] : memref<3x8xf32, #tpu.memory_space<vmem>>, vector<3x8xf32>
    tpu.vector_store %arg10[%c0_18, %c0_19], %23 {strides = array<i32>} : memref<3x8xf32, #tpu.memory_space<vmem>>, vector<3x8xf32>,
    return
  }
  func.func @transform_0(%arg0: i32) -> (i32, i32) {
    %c0_i32 = arith.constant 0 : i32
    %c0_i32_0 = arith.constant 0 : i32
    return %arg0, %c0_i32 : i32, i32
  }
  func.func @transform_1(%arg0: i32) -> (i32, i32) {
    %c0_i32 = arith.constant 0 : i32
    %c0_i32_0 = arith.constant 0 : i32
    return %c0_i32, %arg0 : i32, i32
  }
  func.func @transform_2(%arg0: i32) -> (i32, i32) {
    %c0_i32 = arith.constant 0 : i32
    %c0_i32_0 = arith.constant 0 : i32
    return %c0_i32, %arg0 : i32, i32
  }
  func.func @transform_3(%arg0: i32) -> (i32, i32) {
    %c0_i32 = arith.constant 0 : i32
    %c0_i32_0 = arith.constant 0 : i32
    %c0_i32_1 = arith.constant 0 : i32
    return %c0_i32, %c0_i32_0 : i32, i32
  }
  func.func @transform_4(%arg0: i32) -> (i32, i32) {
    %c0_i32 = arith.constant 0 : i32
    %c0_i32_0 = arith.constant 0 : i32
    %c0_i32_1 = arith.constant 0 : i32
    return %c0_i32, %c0_i32_0 : i32, i32
  }
  func.func @transform_5(%arg0: i32) -> (i32, i32) {
    %c0_i32 = arith.constant 0 : i32
    %c0_i32_0 = arith.constant 0 : i32
    %c0_i32_1 = arith.constant 0 : i32
    return %c0_i32, %c0_i32_0 : i32, i32
  }
  func.func @transform_6(%arg0: i32) -> (i32, i32) {
    %c0_i32 = arith.constant 0 : i32
    %c0_i32_0 = arith.constant 0 : i32
    %c0_i32_1 = arith.constant 0 : i32
    return %c0_i32, %c0_i32_0 : i32, i32
  }
  func.func @transform_7(%arg0: i32) -> (i32, i32) {
    %c0_i32 = arith.constant 0 : i32
    %c0_i32_0 = arith.constant 0 : i32
    %c0_i32_1 = arith.constant 0 : i32
    return %c0_i32, %c0_i32_0 : i32, i32
  }
  func.func @transform_8(%arg0: i32) -> (i32, i32) {
    %c0_i32 = arith.constant 0 : i32
    %c0_i32_0 = arith.constant 0 : i32
    %c0_i32_1 = arith.constant 0 : i32
    return %c0_i32, %c0_i32_0 : i32, i32
  }
  func.func @transform_9(%arg0: i32) -> (i32, i32) {
    %c0_i32 = arith.constant 0 : i32
    %c0_i32_0 = arith.constant 0 : i32
    return %c0_i32, %arg0 : i32, i32
  }
}

</mosaic_0001>

<bundles_post_ra>
// kernel: tpu_custom_call.1
= control target key start
LH: loop header
LB: loop body
LE: loop exit
PB: predicated region body
PF: predicated region fallthrough
CT: control target
= control target key end

     0   :  { %vm134_vm0 = vcmask 56320   ;;  %v545_v1 = vmov 0   ;;  %s826_s0 = inlined_call_operand.vmem [shape: f32[8,7], index: 0, kind: input, shape index: {}]   ;;  %s827_s1 = inlined_call_operand.vmem [shape: f32[1,8], index: 1, kind: input, shape index: {}]   ;;  %s828_s2 = inlined_call_operand.vmem [shape: f32[1,8], index: 2, kind: input, shape index: {}]   ;;  %s829_s3 = inlined_call_operand.vmem [shape: f32[96,7], index: 3, kind: input, shape index: {}]   ;;  %s830_s4 = inlined_call_operand.vmem [shape: f32[96,1], index: 4, kind: input, shape index: {}]   ;;  %s831_s5 = inlined_call_operand.vmem [shape: f32[96,1], index: 5, kind: input, shape index: {}]   ;;  %s832_s6 = inlined_call_operand.vmem [shape: f32[96,1], index: 6, kind: input, shape index: {}]   ;;  %s833_s7 = inlined_call_operand.vmem [shape: f32[3,96], index: 7, kind: input, shape index: {}]   ;;  %s834_s8 = inlined_call_operand.vmem [shape: f32[3,1], index: 8, kind: input, shape index: {}]   ;;  %s835_s9 = inlined_call_operand.hbm [shape: f32[3,8], index: 9, kind: output, shape index: {}]  }
   0x1   :  { %v45_v0 = vld [vmem:[%s826_s0] sm:$0xff]  ;;  %492 = vset.pattern.permute.xlu2 %v545_v1  ;;  %491 = vset.pattern.permute.xlu1 %v545_v1  ;;  %v56_v2 = vld [vmem:[%s830_s4 + $0x50] sm:$0xff]  ;;  %v238_v8 = vld [vmem:[%s831_s5 + $0x58] sm:$0xff] }
   0x2   :  { %v48_v3 = vld [vmem:[%s830_s4 + $0x10] sm:$0xff]  ;;  %490 = vset.pattern.permute.xlu0 %v545_v1  ;;  %472 = vmatpush.xpose.msk.msra.mxu0 %vm134_vm0, %v45_v0  ;;  %v46_v4 = vld [vmem:[%s830_s4] sm:$0xff]  ;;  %v57_v9 = vld [vmem:[%s830_s4 + $0x58] sm:$0xff] }
   0x3   :  { %v33_v5 = vld [vmem:[%s829_s3] sm:$0xff]  ;;  %486 = vmatpush.xpose.msk.msra.mxu2 %vm134_vm0, %v45_v0  ;;  %487 = vmatpush.xpose.msk.msra.mxu3 %vm134_vm0, %v45_v0  ;;  %v47_v10 = vld [vmem:[%s830_s4 + $0x8] sm:$0xff] }
   0x4   :  { %v37_v6 = vld [vmem:[%s829_s3 + $0x20] sm:$0xff]  ;;  %111 = vperm.xlu2 %492, %v56_v2   ;;  %71 = vperm.xlu1 %491, %v48_v3   ;;  %v34_v11 = vld [vmem:[%s829_s3 + $0x8] sm:$0xff] }
   0x5   :  { %v41_v7 = vld [vmem:[%s829_s3 + $0x40] sm:$0xff]  ;;  %61 = vperm.xlu0 %490, %v46_v4   ;;  %473 = vmatmul.msk.f32.vlgmr.msra.gmra.mxu0 %vm134_vm0, %v33_v5 }
   0x6   :  { %477 = vmatmul.msk.f32.vlgmr.msra.gmra.mxu2 %vm134_vm0, %v37_v6  ;;  %481 = vmatmul.msk.f32.vlgmr.msra.gmra.mxu3 %vm134_vm0, %v41_v7 }
   0x7   :  { %14 = vsyncpa [#allocation3], 0  ;;  %v38_v12 = vld [vmem:[%s829_s3 + $0x28] sm:$0xff]  ;;  %v54_v14 = vld [vmem:[%s830_s4 + $0x40] sm:$0xff]  ;;  %vm430_vm1 = vcmask 785408   ;;  %s546_s18 = smov [#allocation2]  }
   0x8   :  { %v42_v13 = vld [vmem:[%s829_s3 + $0x48] sm:$0xff]  ;;  %v237_v15 = vld [vmem:[%s831_s5 + $0x50] sm:$0xff]  ;;  %v53_v20 = vld [vmem:[%s830_s4 + $0x38] sm:$0xff]  ;;  %s463_s20 = sshll.u32 %s835_s9, 4  ;;  %vm454_vm2 = vcmask 59392   ;;  %s464_s20 = int_to_ptr.hbm [resolvable:$true] %s463_s20 }
   0x9   :  { %v55_v16 = vld [vmem:[%s830_s4 + $0x48] sm:$0xff]  ;;  %v35_v17 = vld [vmem:[%s829_s3 + $0x10] sm:$0xff]  ;;  %v338_v21 = vld [vmem:[%s832_s6 + $0x58] sm:$0xff] }
   0xa   :  { %v39_v18 = vld [vmem:[%s829_s3 + $0x30] sm:$0xff]  ;;  %v236_v22 = vld [vmem:[%s831_s5 + $0x48] sm:$0xff]  ;;  %v36_v23 = vld [vmem:[%s829_s3 + $0x18] sm:$0xff] }
   0xb   :  { %v43_v19 = vld [vmem:[%s829_s3 + $0x50] sm:$0xff]  ;;  %v40_v24 = vld [vmem:[%s829_s3 + $0x38] sm:$0xff]  ;;  %v235_v28 = vld [vmem:[%s831_s5 + $0x40] sm:$0xff] }
   0xc   :  { %297 = vperm.xlu2 %492, %v238_v8   ;;  %116 = vperm.xlu1 %491, %v57_v9   ;;  %v44_v25 = vld [vmem:[%s829_s3 + $0x58] sm:$0xff]  ;;  %v52_v26 = vld [vmem:[%s830_s4 + $0x30] sm:$0xff]  ;;  %v51_v29 = vld [vmem:[%s830_s4 + $0x28] sm:$0xff] }
   0xd   :  { %66 = vperm.xlu0 %490, %v47_v10   ;;  %474 = vmatmul.msk.f32.gmra.mxu0 %vm134_vm0, %v34_v11  ;;  %v337_v27 = vld [vmem:[%s832_s6 + $0x50] sm:$0xff]  ;;  %v336_v30 = vld [vmem:[%s832_s6 + $0x48] sm:$0xff]  ;;  %v234_v31 = vld [vmem:[%s831_s5 + $0x38] sm:$0xff] }
   0xe   :  { %478 = vmatmul.msk.f32.gmra.mxu2 %vm134_vm0, %v38_v12  ;;  %482 = vmatmul.msk.f32.gmra.mxu3 %vm134_vm0, %v42_v13  ;;  %v50_v32 = vld [vmem:[%s830_s4 + $0x20] sm:$0xff]  ;;  %v233_v34 = vld [vmem:[%s831_s5 + $0x30] sm:$0xff]  ;;  %v49_v35 = vld [vmem:[%s830_s4 + $0x18] sm:$0xff]  ;;  %s461_s4 = sshll.u32 %s546_s18, 4  ;;  %s462_s4 = int_to_ptr.vmem [resolvable:$true] %s461_s4 }
   0xf   :  { %v335_v33 = vld [vmem:[%s832_s6 + $0x40] sm:$0xff]  ;;  %v334_v36 = vld [vmem:[%s832_s6 + $0x38] sm:$0xff]  ;;  %v232_v37 = vld [vmem:[%s831_s5 + $0x28] sm:$0xff] }
  0x10   :  { %v230_v38 = vld [vmem:[%s831_s5 + $0x18] sm:$0xff]  ;;  %v333_v39 = vld [vmem:[%s832_s6 + $0x30] sm:$0xff]  ;;  %v231_v40 = vld [vmem:[%s831_s5 + $0x20] sm:$0xff] }
  0x11   :  { %v331_v41 = vld [vmem:[%s832_s6 + $0x20] sm:$0xff]  ;;  %v229_v42 = vld [vmem:[%s831_s5 + $0x10] sm:$0xff]  ;;  %v332_v43 = vld [vmem:[%s832_s6 + $0x28] sm:$0xff] }
  0x12   :  { %v227_v44 = vld [vmem:[%s831_s5] sm:$0xff]  ;;  %v330_v45 = vld [vmem:[%s832_s6 + $0x18] sm:$0xff]  ;;  %v228_v46 = vld [vmem:[%s831_s5 + $0x8] sm:$0xff] }
  0x13   :  { %v327_v47 = vld [vmem:[%s832_s6] sm:$0xff]  ;;  %v328_v48 = vld [vmem:[%s832_s6 + $0x8] sm:$0xff]  ;;  %v329_v49 = vld [vmem:[%s832_s6 + $0x10] sm:$0xff] }
  0x14   :  { %101 = vperm.xlu2 %492, %v54_v14   ;;  %292 = vperm.xlu1 %491, %v237_v15   ;;  %v424_v51 = vld [vmem:[%s834_s8] sm:$0x7] }
  0x15   :  { %106 = vperm.xlu0 %490, %v55_v16   ;;  %475 = vmatmul.msk.f32.gmra.mxu0 %vm134_vm0, %v35_v17  ;;  %v777_v8 = vld [vmem:[%s827_s1] ss:$0 sm:$0xff] }
  0x16   :  { %479 = vmatmul.msk.f32.gmra.mxu2 %vm134_vm0, %v39_v18  ;;  %483 = vmatmul.msk.f32.gmra.mxu3 %vm134_vm0, %v43_v19  ;;  %v783_v12 = vld [vmem:[%s828_s2] ss:$0 sm:$0xff] }
  0x1c   :  { %96 = vperm.xlu2 %492, %v53_v20   ;;  %396 = vperm.xlu1 %491, %v338_v21  }
  0x1d   :  { %287 = vperm.xlu0 %490, %v236_v22   ;;  %476 = vmatmul.msk.f32.gmra.mxu0 %vm134_vm0, %v36_v23 }
  0x1e   :  { %480 = vmatmul.msk.f32.gmra.mxu2 %vm134_vm0, %v40_v24  ;;  %484 = vmatmul.msk.f32.gmra.mxu3 %vm134_vm0, %v44_v25 }
  0x24   :  { %91 = vperm.xlu2 %492, %v52_v26   ;;  %391 = vperm.xlu1 %491, %v337_v27  }
  0x25   :  { %282 = vperm.xlu0 %490, %v235_v28  }
  0x2c   :  { %86 = vperm.xlu2 %492, %v51_v29   ;;  %386 = vperm.xlu1 %491, %v336_v30  }
  0x2d   :  { %277 = vperm.xlu0 %490, %v234_v31  }
  0x34   :  { %81 = vperm.xlu2 %492, %v50_v32   ;;  %381 = vperm.xlu1 %491, %v335_v33  }
  0x35   :  { %272 = vperm.xlu0 %490, %v233_v34  }
  0x3c   :  { %76 = vperm.xlu2 %492, %v49_v35   ;;  %376 = vperm.xlu1 %491, %v334_v36  }
  0x3d   :  { %267 = vperm.xlu0 %490, %v232_v37  }
  0x44   :  { %257 = vperm.xlu2 %492, %v230_v38   ;;  %371 = vperm.xlu1 %491, %v333_v39  }
  0x45   :  { %262 = vperm.xlu0 %490, %v231_v40  }
  0x4c   :  { %361 = vperm.xlu2 %492, %v331_v41   ;;  %252 = vperm.xlu1 %491, %v229_v42  }
  0x4d   :  { %366 = vperm.xlu0 %490, %v332_v43  }
  0x54   :  { %242 = vperm.xlu2 %492, %v227_v44   ;;  %356 = vperm.xlu1 %491, %v330_v45  }
  0x55   :  { %247 = vperm.xlu0 %490, %v228_v46  }
  0x5c   :  { %341 = vperm.xlu2 %492, %v327_v47   ;;  %346 = vperm.xlu1 %491, %v328_v48  }
  0x5d   :  { %351 = vperm.xlu0 %490, %v329_v49  }
  0x5e   :  { %v112_v50 = vpop.permute.xlu2 %111 }
  0x5f   :  { %v132_v9 = vmul.f32 %v777_v8, %v112_v50 }
  0x65   :  { %427 = vperm.xlu0 %490, %v424_v51  }
  0x66   :  { %v298_v52 = vpop.permute.xlu2 %297 }
  0x67   :  { %v314_v20 = vmul.f32 %v783_v12, %v298_v52 }
  0x6e   :  { %v102_v53 = vpop.permute.xlu2 %101 }
  0x6f   :  { %v130_v25 = vmul.f32 %v777_v8, %v102_v53 }
  0x76   :  { %v762_v54 = vpop.permute.xlu1 %71  ;;  %v97_v56 = vpop.permute.xlu2 %96 }
  0x77   :  { %v764_v55 = vpop.permute.xlu0 %61  ;;  %v129_v35 = vmul.f32 %v777_v8, %v97_v56 }
  0x7e   :  { %v117_v57 = vpop.permute.xlu1 %116  ;;  %v92_v61 = vpop.permute.xlu2 %91 }
  0x7f   :  { %v766_v58 = vpop.permute.xlu0 %66  ;;  %v133_v16 = vmul.f32 %v777_v8, %v117_v57  ;;  %v128_v50 = vmul.f32 %v777_v8, %v92_v61 }
  0x82   :  { %v789_v21 = vpop.f32.mrf.mxu0 }
  0x86   :  { %v293_v59 = vpop.permute.xlu1 %292  ;;  %v772_v4 = vpop.permute.xlu2 %86 }
  0x87   :  { %v107_v60 = vpop.permute.xlu0 %106  ;;  %v313_v17 = vmul.f32 %v783_v12, %v293_v59 }
  0x88   :  { %v131_v18 = vmul.f32 %v777_v8, %v107_v60 }
  0x89   :  { %v768_v62 = vpop.f32.mrf.mxu2  ;;  %v215_v63 = vpop.f32.mrf.mxu3 }
  0x8a   :  { %v216_v29 = vadd.f32 %v215_v63, %v130_v25  ;;  %v796_v43 = vpop.f32.mrf.mxu0 }
  0x8e   :  { %v397_v0 = vpop.permute.xlu1 %396  ;;  %v82_v11 = vpop.permute.xlu2 %81 }
  0x8f   :  { %v288_v1 = vpop.permute.xlu0 %287  ;;  %v126_v60 = vmul.f32 %v777_v8, %v82_v11 }
  0x90   :  { %v312_v26 = vmul.f32 %v783_v12, %v288_v1 }
  0x91   :  { %v218_v2 = vpop.f32.mrf.mxu3  ;;  %v770_v3 = vpop.f32.mrf.mxu2 }
  0x92   :  { %v219_v22 = vadd.f32 %v218_v2, %v131_v18  ;;  %v197_v63 = vpop.f32.mrf.mxu0 }
  0x94   :  { %v324_v31 = vadd.f32 %v312_v26, %v219_v22 }
  0x96   :  { %v392_v5 = vpop.permute.xlu1 %391  ;;  %v77_v36 = vpop.permute.xlu2 %76 }
  0x97   :  { %v283_v6 = vpop.permute.xlu0 %282  ;;  %v125_v22 = vmul.f32 %v777_v8, %v77_v36 }
  0x98   :  { %v311_v27 = vmul.f32 %v783_v12, %v283_v6  ;;  %v127_v6 = vmul.f32 %v777_v8, %v772_v4 }
  0x99   :  { %v221_v7 = vpop.f32.mrf.mxu3  ;;  %v209_v10 = vpop.f32.mrf.mxu2 }
  0x9a   :  { %v222_v13 = vadd.f32 %v221_v7, %v132_v9  ;;  %v323_v39 = vadd.f32 %v311_v27, %v216_v29  ;;  %v210_v56 = vadd.f32 %v209_v10, %v128_v50  ;;  %v204_v7 = vadd.f32 %v768_v62, %v126_v60  ;;  %v200_v18 = vpop.f32.mrf.mxu0 }
  0x9b   :  { %v201_v62 = vadd.f32 %v200_v18, %v125_v22  ;;  %v124_v29 = vmul.f32 %v777_v8, %v762_v54 }
  0x9c   :  { %v325_v23 = vadd.f32 %v313_v17, %v222_v13  ;;  %v207_v13 = vadd.f32 %v770_v3, %v127_v6 }
  0x9e   :  { %v387_v14 = vpop.permute.xlu1 %386  ;;  %v409_v30 = vadd.f32 %v392_v5, %v325_v23  ;;  %v258_v51 = vpop.permute.xlu2 %257 }
  0x9f   :  { %v278_v15 = vpop.permute.xlu0 %277  ;;  %v408_v38 = vadd.f32 %v387_v14, %v324_v31  ;;  %v306_v4 = vmul.f32 %v783_v12, %v258_v51 }
  0xa0   :  { %v310_v42 = vmul.f32 %v783_v12, %v278_v15 }
  0xa1   :  { %v224_v19 = vpop.f32.mrf.mxu3  ;;  %v212_v32 = vpop.f32.mrf.mxu2 }
  0xa2   :  { %v225_v24 = vadd.f32 %v224_v19, %v133_v16  ;;  %v213_v40 = vadd.f32 %v212_v32, %v129_v35  ;;  %v198_v35 = vadd.f32 %v197_v63, %v124_v29 }
  0xa4   :  { %v326_v28 = vadd.f32 %v314_v20, %v225_v24  ;;  %v322_v44 = vadd.f32 %v310_v42, %v213_v40  ;;  %v318_v24 = vadd.f32 %v306_v4, %v201_v62 }
  0xa6   :  { %v382_v33 = vpop.permute.xlu1 %381  ;;  %v410_v34 = vadd.f32 %v397_v0, %v326_v28  ;;  %v362_v10 = vpop.permute.xlu2 %361 }
  0xa7   :  { %v273_v37 = vpop.permute.xlu0 %272  ;;  %v407_v41 = vadd.f32 %v382_v33, %v323_v39  ;;  %v122_v33 = vmul.f32 %v777_v8, %v764_v55 }
  0xa8   :  { %495 = vtanh.f32 %v410_v34  ;;  %v309_v52 = vmul.f32 %v783_v12, %v273_v37 }
  0xa9   :  { %497 = vtanh.f32 %v409_v30  ;;  %v123_v30 = vmul.f32 %v777_v8, %v766_v58  ;;  %v192_v37 = vadd.f32 %v789_v21, %v122_v33 }
  0xaa   :  { %499 = vtanh.f32 %v408_v38  ;;  %v321_v59 = vadd.f32 %v309_v52, %v210_v56 }
  0xab   :  { %501 = vtanh.f32 %v407_v41  ;;  %v195_v34 = vadd.f32 %v796_v43, %v123_v30 }
  0xae   :  { %v496_v45 = vpop.eup %495  ;;  %v377_v46 = vpop.permute.xlu1 %376 }
  0xaf   :  { %v406_v47 = vadd.f32 %v377_v46, %v322_v44  ;;  %v268_v48 = vpop.permute.xlu0 %267  ;;  %438 = vmatpush.msra.mxu1 %v496_v45  ;;  %v498_v49 = vpop.eup %497 }
  0xb0   :  { %v500_v53 = vpop.eup %499  ;;  %v308_v9 = vmul.f32 %v783_v12, %v268_v48  ;;  %v243_v23 = vpop.permute.xlu2 %242 }
  0xb1   :  { %503 = vtanh.f32 %v406_v47  ;;  %439 = vmatpush.msra.mxu1 %v498_v49  ;;  %v502_v57 = vpop.eup %501  ;;  %v303_v36 = vmul.f32 %v783_v12, %v243_v23 }
  0xb2   :  { %v320_v15 = vadd.f32 %v308_v9, %v207_v13 }
  0xb3   :  { %440 = vmatpush.msra.mxu1 %v500_v53  ;;  %v315_v42 = vadd.f32 %v303_v36, %v192_v37 }
  0xb5   :  { %441 = vmatpush.msra.mxu1 %v502_v57 }
  0xb6   :  { %v372_v0 = vpop.permute.xlu1 %371 }
  0xb7   :  { %v504_v1 = vpop.eup %503  ;;  %v405_v2 = vadd.f32 %v372_v0, %v321_v59  ;;  %v263_v5 = vpop.permute.xlu0 %262 }
  0xb8   :  { %v307_v61 = vmul.f32 %v783_v12, %v263_v5  ;;  %442 = vmatpush.msra.mxu1 %v504_v1  ;;  %v342_v58 = vpop.permute.xlu2 %341 }
  0xb9   :  { %505 = vtanh.f32 %v405_v2  ;;  %v399_v46 = vadd.f32 %v342_v58, %v315_v42 }
  0xba   :  { %v319_v11 = vadd.f32 %v307_v61, %v204_v7 }
  0xbc   :  { %v403_v19 = vadd.f32 %v362_v10, %v319_v11 }
  0xbe   :  { %v253_v14 = vpop.permute.xlu1 %252 }
  0xbf   :  { %v367_v16 = vpop.permute.xlu0 %366  ;;  %v506_v17 = vpop.eup %505  ;;  %v305_v31 = vmul.f32 %v783_v12, %v253_v14 }
  0xc0   :  { %v404_v20 = vadd.f32 %v367_v16, %v320_v15  ;;  %443 = vmatpush.msra.mxu1 %v506_v17 }
  0xc1   :  { %v317_v39 = vadd.f32 %v305_v31, %v198_v35 }
  0xc2   :  { %507 = vtanh.f32 %v404_v20 }
  0xc3   :  { %509 = vtanh.f32 %v403_v19 }
  0xc6   :  { %v357_v25 = vpop.permute.xlu1 %356 }
  0xc7   :  { %v402_v3 = vadd.f32 %v357_v25, %v318_v24  ;;  %v248_v26 = vpop.permute.xlu0 %247 }
  0xc8   :  { %v508_v27 = vpop.eup %507  ;;  %v304_v32 = vmul.f32 %v783_v12, %v248_v26  ;;  %v423_v12 = vld [vmem:[%s833_s7] sm:$0x7] }
  0xc9   :  { %511 = vtanh.f32 %v402_v3  ;;  %444 = vmatpush.msra.mxu1 %v508_v27  ;;  %v510_v28 = vpop.eup %509 }
  0xca   :  { %v316_v54 = vadd.f32 %v304_v32, %v195_v34 }
  0xcb   :  { %445 = vmatpush.msra.mxu1 %v510_v28 }
  0xce   :  { %v347_v38 = vpop.permute.xlu1 %346 }
  0xcf   :  { %v512_v40 = vpop.eup %511  ;;  %v352_v41 = vpop.permute.xlu0 %351  ;;  %v400_v44 = vadd.f32 %v347_v38, %v316_v54 }
  0xd0   :  { %v401_v45 = vadd.f32 %v352_v41, %v317_v39  ;;  %446 = vmatpush.msra.mxu1 %v512_v40 }
  0xd2   :  { %513 = vtanh.f32 %v401_v45 }
  0xd3   :  { %515 = vtanh.f32 %v400_v44 }
  0xd4   :  { %517 = vtanh.f32 %v399_v46 }
  0xd7   :  { %v428_v43 = vpop.permute.xlu0 %427 }
  0xd8   :  { %v514_v55 = vpop.eup %513 }
  0xd9   :  { %447 = vmatpush.msra.mxu1 %v514_v55  ;;  %v516_v8 = vpop.eup %515 }
  0xda   :  { %v518_v21 = vpop.eup %517 }
  0xdb   :  { %448 = vmatpush.msra.mxu1 %v516_v8 }
  0xdd   :  { %449 = vmatpush.msra.mxu1 %v518_v21 }
  0xde   :  { %485 = vmatmul.msk.f32.vlgmr.msra.gmra.mxu1 %vm430_vm1, %v423_v12 }
 0x15b   :  { %v451_v47 = vpop.f32.mrf.mxu1 }
 0x15c   :  { %v452_v48 = vadd.f32 %v451_v47, %v428_v43 }
 0x15e   :  { %455 = vst.msk [vmem:[#allocation2] sm:$0x7] %vm454_vm2, %v452_v48 }
 0x15f   :  { %466 = dma.vmem_to_hbm [thread:$0]  %s462_s4, 64, %s464_s20, [#allocation3]  }
 0x160   :  { %543 = dma.done.wait [#allocation3], 64  }
 0x161   :  { %544 = vsyncadd [#allocation3], 4294967232 }
 0x162   :  { %471 = vsyncpa [#allocation3], 1 }

</bundles_post_ra>
